<compile_context>
chip_gen: v7x
topology: tpu7x:2x2x1
jax: 0.10.0
libtpu: 0.0.40
codegen_flags: <defaults>
</compile_context>

<pallas_src>
import jax
import jax.numpy as jnp
import numpy as np
from jax.experimental import pallas as pl
from jax.experimental.pallas import tpu as pltpu


# ---------------------------------------------------------------------------
# Primary path: zero-copy identity via input/output buffer aliasing.
# ---------------------------------------------------------------------------
def _identity_alias_kernel(x_ref, o_ref):
    # The output buffer is aliased to the input buffer, so its contents are
    # already the input; no bytes have to move through HBM or VMEM.  `touch`
    # just pins a (fake) read+write dependency on the aliased output so the
    # call has a well-defined effect on it.
    del x_ref
    pltpu.touch(o_ref)


def _pallas_identity_aliased(x):
    return pl.pallas_call(
        _identity_alias_kernel,
        out_shape=jax.ShapeDtypeStruct(x.shape, x.dtype),
        in_specs=[pl.BlockSpec(memory_space=pl.ANY)],
        out_specs=pl.BlockSpec(memory_space=pl.ANY),
        input_output_aliases={0: 0},
    )(x)


# ---------------------------------------------------------------------------
# Fallback / explicit-materialization path: tiled lane-dense streaming copy.
# ---------------------------------------------------------------------------
def _identity_copy_kernel(x_ref, o_ref):
    o_ref[...] = x_ref[...]


def _round_up(a, b):
    return pl.cdiv(a, b) * b


def pallas_identity_copy(x):
    """Identity as an explicit tiled HBM->VMEM->HBM streaming copy."""
    orig_shape = x.shape
    n = x.size
    if n == 0:
        return x

    flat = x.reshape(-1)
    itemsize = flat.dtype.itemsize
    # Sublane granularity of one packed vreg row-group for this dtype
    # (8 rows for 32-bit, 16 for bf16, 32 for int8).
    sub = 8 * max(1, 4 // itemsize)

    # ---- lane width: largest multiple of 128 dividing n that still leaves
    # ---- at least `sub` rows (full (sub,128) vregs, multi-step grids). -----
    C = 0
    for cand in range(4096, 127, -128):
        if n % cand == 0 and n // cand >= sub:
            C = cand
            break
    if C == 0:  # small arrays: accept any 128-multiple divisor at all
        for cand in range(4096, 127, -128):
            if n % cand == 0:
                C = cand
                break
    if C == 0:
        # TODO(synk): for large non-128-divisible inputs a 128-aligned main
        # body plus a small remainder call would restore unmasked stores.
        C = orig_shape[-1] if x.ndim >= 1 else 1
    x2 = flat.reshape(n // C, C)
    R, C = x2.shape

    # ---- per-chip VMEM budget ---------------------------------------------
    try:
        vmem_cap = int(pltpu.get_tpu_info().vmem_capacity_bytes)
    except Exception:
        vmem_cap = 64 * 1024 * 1024  # conservative (v7x per-TC VMEM)
    # One block; real footprint is ~4x (in + out, each double-buffered).
    vmem_block_bytes = max(1 << 20, min(vmem_cap // 8, 16 * 1024 * 1024))

    # ---- row tile: as big as the budget allows, but keep enough grid steps
    # ---- for read/write DMA overlap (and >= 4 steps per v7x TensorCore). ---
    bytes_per_row = max(1, C * itemsize)
    tr = max(sub, (vmem_block_bytes // bytes_per_row) // sub * sub)
    if R >= 8 * sub:
        tr = min(tr, _round_up(pl.cdiv(R, 8), sub))
    elif R >= 4 * sub:
        tr = min(tr, _round_up(pl.cdiv(R, 4), sub))
    if tr >= R:
        tr = R  # full-extent block: no (8,128) divisibility constraint
    grid = (pl.cdiv(R, tr),)

    block_bytes = tr * bytes_per_row
    vmem_limit_bytes = int(
        min(vmem_cap * 3 // 4, max(16 * 1024 * 1024, 4 * block_bytes + (4 << 20)))
    )

    out2 = pl.pallas_call(
        _identity_copy_kernel,
        out_shape=jax.ShapeDtypeStruct((R, C), x2.dtype),
        grid_spec=pltpu.PrefetchScalarGridSpec(
            num_scalar_prefetch=0,
            grid=grid,
            in_specs=[pl.BlockSpec((tr, C), lambda i: (i, 0))],
            out_specs=pl.BlockSpec((tr, C), lambda i: (i, 0)),
        ),
        compiler_params=pltpu.CompilerParams(
            dimension_semantics=("parallel",),
            vmem_limit_bytes=vmem_limit_bytes,
        ),
        cost_estimate=pl.CostEstimate(
            flops=0, transcendentals=0, bytes_accessed=2 * n * itemsize
        ),
    )(x2)

    return out2.reshape(orig_shape)


# ---------------------------------------------------------------------------
# Public entry point.
# ---------------------------------------------------------------------------
def pallas_identity(x):
    """Identity forward (y = x).

    Primary path aliases the output to the input buffer (zero bytes moved);
    falls back to the tiled streaming copy if aliasing can't be lowered on
    the current backend.
    """
    if x.size == 0:
        return x
    try:
        return _pallas_identity_aliased(x)
    except Exception:  # defensive fallback: correct, bandwidth-bound copy
        return pallas_identity_copy(x)


if __name__ == "__main__":
    key = jax.random.PRNGKey(0)

    # Main case: small conv-style activation (batch=2, channels=4, 16x16).
    x = jax.random.normal(key, (2, 4, 16, 16), jnp.float32)
    y = jax.block_until_ready(pallas_identity(x))
    np.testing.assert_array_equal(np.asarray(y), np.asarray(x))

    # Explicit streaming-copy variant on the same input.
    y_copy = jax.block_until_ready(pallas_identity_copy(x))
    np.testing.assert_array_equal(np.asarray(y_copy), np.asarray(x))

    # Non-128-aligned last dim.
    x_b = jax.random.normal(jax.random.PRNGKey(1), (8, 27), jnp.float32)
    y_b = jax.block_until_ready(pallas_identity(x_b))
    np.testing.assert_array_equal(np.asarray(y_b), np.asarray(x_b))
    y_b2 = jax.block_until_ready(pallas_identity_copy(x_b))
    np.testing.assert_array_equal(np.asarray(y_b2), np.asarray(x_b))

    # Native low-precision dtype passes straight through (no forced upcast).
    x_c = jax.random.normal(jax.random.PRNGKey(2), (16, 384)).astype(jnp.bfloat16)
    y_c = jax.block_until_ready(pallas_identity(x_c))
    np.testing.assert_array_equal(np.asarray(y_c), np.asarray(x_c))
    y_c2 = jax.block_until_ready(pallas_identity_copy(x_c))
    np.testing.assert_array_equal(np.asarray(y_c2), np.asarray(x_c))

    print("KERNEL_OK")
</pallas_src>

<mosaic_0001>
module attributes {stable_mosaic.version = 11 : i64} {
  func.func @_identity_alias_kernel(%arg0: memref<2x4x16x16xf32, #tpu.memory_space<any>>, %arg1: memref<2x4x16x16xf32, #tpu.memory_space<any>>) attributes {dimension_semantics = [], scalar_prefetch = 0 : i64, scratch_operands = 0 : i64, tpu.core_type = #tpu.core_type<tc>} {
    return
  }
}

module attributes {stable_mosaic.version = 11 : i64} {
  func.func @_identity_copy_kernel(%arg0: i32, %arg1: memref<8x256xf32, #tpu.memory_space<vmem>>, %arg2: memref<8x256xf32, #tpu.memory_space<vmem>>) attributes {dimension_semantics = [#tpu.dimension_semantics<parallel>], iteration_bounds = array<i64: 1>, scalar_prefetch = 0 : i64, scratch_operands = 0 : i64, tpu.core_type = #tpu.core_type<tc>, window_params = [{transform_indices = @transform_0, window_bounds = array<i64: 8, 256>}, {transform_indices = @transform_1, window_bounds = array<i64: 8, 256>}]} {
    %c0 = arith.constant 0 : index
    %c0_0 = arith.constant 0 : index
    %0 = vector.load %arg1[%c0, %c0_0] : memref<8x256xf32, #tpu.memory_space<vmem>>, vector<8x256xf32>
    %c0_1 = arith.constant 0 : index
    %c0_2 = arith.constant 0 : index
    %1 = vector.load %arg2[%c0_1, %c0_2] : memref<8x256xf32, #tpu.memory_space<vmem>>, vector<8x256xf32>
    tpu.vector_store %arg2[%c0_1, %c0_2], %0 {strides = array<i32>} : memref<8x256xf32, #tpu.memory_space<vmem>>, vector<8x256xf32>,
    return
  }
  func.func @transform_0(%arg0: i32) -> (i32, i32) {
    %c0_i32 = arith.constant 0 : i32
    %c0_i32_0 = arith.constant 0 : i32
    return %arg0, %c0_i32 : i32, i32
  }
  func.func @transform_1(%arg0: i32) -> (i32, i32) {
    %c0_i32 = arith.constant 0 : i32
    %c0_i32_0 = arith.constant 0 : i32
    return %arg0, %c0_i32 : i32, i32
  }
}

</mosaic_0001>

<bundles_post_ra>
// kernel: tpu_custom_call.1
= control target key start
LH: loop header
LB: loop body
LE: loop exit
PB: predicated region body
PF: predicated region fallthrough
CT: control target
= control target key end

     0   :  { %s16_s0 = inlined_call_operand.hbm [shape: f32[2,4,16,16], index: 0, kind: input, shape index: {}, may-alias: {0,1}]   ;;  %s17_s1 = inlined_call_operand.hbm [shape: f32[2,4,16,16], index: 1, kind: output, shape index: {}, may-alias: {0,1}]  }

// kernel: tpu_custom_call.1
= control target key start
LH: loop header
LB: loop body
LE: loop exit
PB: predicated region body
PF: predicated region fallthrough
CT: control target
= control target key end

     0   :  { %6 = vsyncpa [#allocation3], 0  ;;  %s126_s0 = inlined_call_operand.hbm [shape: f32[8,256], index: 0, kind: input, shape index: {}]   ;;  %s127_s1 = inlined_call_operand.hbm [shape: f32[8,256], index: 1, kind: output, shape index: {}]  }
   0x1   :  { %7 = vsyncpa [#allocation4], 0  ;;  %s90_s6 = smov [#allocation2]   ;;  %s42_s10 = scalar_lea.hbm %s126_s0, 256 }
   0x2   :  { %s14_s7 = sshll.u32 %s90_s6, 4  ;;  %p43_p0 = scmp.ne.s32.totalorder %s126_s0, %s42_s10  ;;  %s15_s7 = int_to_ptr.vmem [resolvable:$true] %s14_s7 }
   0x3   :  { %p46_p1 = scmp.lt.u32.totalorder %s42_s10, %s126_s0 }
   0x5   :  { %p48_p2 = pnand %p46_p1, %p43_p0 }
   0x7   :  { %51 = shalt.err (!%p48_p2)
}
   0x8   :  { %s52_s15 = scalar_lea.vmem %s15_s7, 256  ;;  %p57_p4 = scmp.lt.s32.totalorder %s15_s7, %s15_s7 }
   0x9   :  { %p53_p3 = scmp.ne.s32.totalorder %s15_s7, %s52_s15  ;;  %p58_p5 = scmp.lt.s32.totalorder %s52_s15, %s52_s15 }
   0xb   :  { %p59_p6 = por %p58_p5, %p57_p4 }
   0xd   :  { %p60_p7 = pnand %p59_p6, %p53_p3 }
   0xf   :  { %63 = shalt.err (!%p60_p7)
}
  0x10   :  { %17 = dma.hbm_to_vmem [thread:$0]  %s126_s0, 256, %s15_s7, [#allocation3]  }
  0x11   :  { %86 = dma.done.wait [#allocation3], 256  }
  0x12   :  { %87 = vsyncadd [#allocation3], 4294967040  ;;  %s91_s18 = smov [#allocation5]   ;;  %v21_v0 = vld [vmem:[#allocation2] sm:$0xff]  ;;  %v22_v1 = vld [vmem:[#allocation2 + $0x8] sm:$0xff] }
  0x13   :  { %s31_s19 = sshll.u32 %s91_s18, 4  ;;  %23 = vst [vmem:[#allocation5] sm:$0xff] %v21_v0  ;;  %24 = vst [vmem:[#allocation5 + $0x8] sm:$0xff] %v22_v1  ;;  %s32_s19 = int_to_ptr.vmem [resolvable:$true] %s31_s19 }
  0x14   :  { %s64_s20 = scalar_lea.vmem %s32_s19, 256  ;;  %p69_p9 = scmp.lt.s32.totalorder %s32_s19, %s32_s19 }
  0x15   :  { %p65_p8 = scmp.ne.s32.totalorder %s32_s19, %s64_s20  ;;  %p70_p10 = scmp.lt.s32.totalorder %s64_s20, %s64_s20 }
  0x17   :  { %p71_p11 = por %p70_p10, %p69_p9 }
  0x19   :  { %p72_p12 = pnand %p71_p11, %p65_p8 }
  0x1b   :  { %75 = shalt.err (!%p72_p12)
}
  0x1c   :  { %s76_s0 = scalar_lea.hbm %s127_s1, 256 }
  0x1d   :  { %p77_p13 = scmp.ne.s32.totalorder %s127_s1, %s76_s0  ;;  %p80_p0 = scmp.lt.u32.totalorder %s76_s0, %s127_s1 }
  0x1f   :  { %p82_p1 = pnand %p80_p0, %p77_p13 }
  0x21   :  { %85 = shalt.err (!%p82_p1)
}
  0x22   :  { %34 = dma.vmem_to_hbm [thread:$0]  %s32_s19, 256, %s127_s1, [#allocation4]  }
  0x23   :  { %88 = dma.done.wait [#allocation4], 256  }
  0x24   :  { %89 = vsyncadd [#allocation4], 4294967040 }
  0x25   :  { %38 = vsyncpa [#allocation3], 1 }
  0x26   :  { %39 = vsyncpa [#allocation4], 1 }

</bundles_post_ra>
